<compile_context>
chip_gen: v6e
topology: v6e:2x2x1
jax: 0.10.0
libtpu: 0.0.40
codegen_flags: <defaults>
</compile_context>

<pallas_src>
import math

import jax
import jax.numpy as jnp
from jax.experimental import pallas as pl
from jax.experimental.pallas import tpu as pltpu


def _round_up(x: int, m: int) -> int:
    return ((x + m - 1) // m) * m


def _cdiv(a: int, b: int) -> int:
    return (a + b - 1) // b


def _split(dim: int, align: int, target: int, min_blocks: int = 1):
    """Pad `dim` to a multiple of `align`, then split into `n >= min_blocks`
    equal, align-multiple tiles of size ~<= target.

    Returns (tile, padded_dim, n_blocks) with padded_dim == tile * n_blocks.
    """
    padded = _round_up(dim, align)
    n = max(_cdiv(padded, target), min_blocks)
    tile = _round_up(_cdiv(padded, n), align)
    return tile, tile * n, n


def _linear_kernel(x_ref, w_ref, b_ref, o_ref):
    k = pl.program_id(2)
    # bf16 x bf16 (or f32 x f32) -> f32 on the MXU.  The f32 output block is
    # resident across the K axis, so accumulate into it directly: no VMEM
    # scratch, no finalize copy pass on the single vst slot.
    part = jnp.dot(x_ref[...], w_ref[...], preferred_element_type=jnp.float32)

    @pl.when(k == 0)
    def _first():
        o_ref[...] = b_ref[...] + part          # bias folded into first write

    @pl.when(k > 0)
    def _rest():
        o_ref[...] += part


def embedding_classifier(
    x,
    weight,
    bias,
    *,
    compute_dtype=jnp.bfloat16,
    tm_target=512,
    tn_cap=1024,
    tk_cap=2048,
):
    """Forward pass of EmbeddingClassifier (nn.Linear): x @ W^T + b.

    Args:
      x:      (batch, emd_dim) float32
      weight: (output_dim, emd_dim) float32   -- PyTorch nn.Linear layout
      bias:   (output_dim,) float32
    Returns:
      (batch, output_dim), dtype of x.
    """
    batch, emd_dim = x.shape
    output_dim, emd_dim_w = weight.shape
    assert emd_dim_w == emd_dim
    assert bias.shape == (output_dim,)

    # Tile choice: pad only to hardware minima; >=2 M blocks once batch >= 256
    # so both v7x TensorCores are used; N/K collapse for classifier-sized heads
    # (W + bias then stay VMEM-resident and only x streams from HBM).
    min_m_blocks = 2 if _round_up(batch, 8) >= 256 else 1
    TM, Mp, gm = _split(batch, 8, tm_target, min_m_blocks)
    TN, Np, gn = _split(output_dim, 128, tn_cap)
    TK, Kp, gk = _split(emd_dim, 128, tk_cap)

    # One-time wrapper-side prep: bf16 cast (halves x/W HBM traffic) and a
    # single W transpose to (K, N) so the kernel dot needs no operand swizzle.
    xc = jnp.asarray(x, compute_dtype)
    wc = jnp.asarray(weight.T, compute_dtype)
    bp = jnp.asarray(bias, jnp.float32)

    # Zero-pad to the (small) aligned shapes.  K MUST be zero-padded (padded K
    # feeds valid outputs); padded M rows / N cols only produce rows/cols that
    # are sliced off below.
    if (Mp, Kp) != (batch, emd_dim):
        xc = jnp.pad(xc, ((0, Mp - batch), (0, Kp - emd_dim)))
    if (Kp, Np) != (emd_dim, output_dim):
        wc = jnp.pad(wc, ((0, Kp - emd_dim), (0, Np - output_dim)))
    if Np != output_dim:
        bp = jnp.pad(bp, ((0, Np - output_dim),))
    bp = bp.reshape(1, Np)

    grid = (gm, gn, gk)  # K innermost: output block stays resident -> in-place accumulate

    out = pl.pallas_call(
        _linear_kernel,
        out_shape=jax.ShapeDtypeStruct((Mp, Np), jnp.float32),
        grid_spec=pltpu.PrefetchScalarGridSpec(
            num_scalar_prefetch=0,
            grid=grid,
            in_specs=[
                pl.BlockSpec((TM, TK), lambda i, j, k: (i, k)),  # x   (streams from HBM)
                pl.BlockSpec((TK, TN), lambda i, j, k: (k, j)),  # W^T (VMEM-resident when gn=gk=1)
                pl.BlockSpec((1, TN), lambda i, j, k: (0, j)),   # bias
            ],
            out_specs=pl.BlockSpec((TM, TN), lambda i, j, k: (i, j)),
        ),
        compiler_params=pltpu.CompilerParams(
            dimension_semantics=("parallel", "parallel", "arbitrary"),
            vmem_limit_bytes=48 * 1024 * 1024,
        ),
    )(xc, wc, bp)

    if (Mp, Np) != (batch, output_dim):
        out = out[:batch, :output_dim]
    return out.astype(x.dtype)


if __name__ == "__main__":
    key = jax.random.PRNGKey(0)

    def make_case(batch, emd_dim, output_dim, k):
        kx, kw, kb = jax.random.split(k, 3)
        bound = 1.0 / math.sqrt(emd_dim)
        w = jax.random.uniform(kw, (output_dim, emd_dim), jnp.float32, -bound, bound)
        b = jax.random.uniform(kb, (output_dim,), jnp.float32, -bound, bound)
        x = jax.random.normal(kx, (batch, emd_dim), jnp.float32)
        ref = jnp.dot(x, w.T, precision=jax.lax.Precision.HIGHEST) + b
        return x, w, b, ref

    k1, k2 = jax.random.split(key)

    # 1) Small shapes consistent with the module (single-block grid).
    x, w, b, ref = make_case(batch=8, emd_dim=32, output_dim=16, k=k1)
    out = jax.block_until_ready(embedding_classifier(x, w, b))  # default bf16 compute
    assert out.shape == (8, 16) and out.dtype == x.dtype
    assert jnp.allclose(out, ref, atol=5e-2, rtol=5e-2)
    out_f32 = jax.block_until_ready(
        embedding_classifier(x, w, b, compute_dtype=jnp.float32)
    )
    assert jnp.allclose(out_f32, ref, atol=5e-2, rtol=5e-2)

    # 2) Non-aligned, multi-block case: exercises M/N/K padding, 2 M blocks
    #    (v7x megacore path) and >1 K block (in-place accumulation path).
    x2, w2, b2, ref2 = make_case(batch=300, emd_dim=2200, output_dim=130, k=k2)
    out2 = jax.block_until_ready(embedding_classifier(x2, w2, b2))
    assert out2.shape == (300, 130)
    assert jnp.allclose(out2, ref2, atol=5e-2, rtol=5e-2)
    out2_f32 = jax.block_until_ready(
        embedding_classifier(x2, w2, b2, compute_dtype=jnp.float32)
    )
    assert jnp.allclose(out2_f32, ref2, atol=5e-2, rtol=5e-2)

    print("KERNEL_OK")
</pallas_src>

<mosaic_0001>
module attributes {stable_mosaic.version = 11 : i64} {
  func.func @_linear_kernel(%arg0: i32, %arg1: i32, %arg2: i32, %arg3: memref<8x128xbf16, #tpu.memory_space<vmem>>, %arg4: memref<128x128xbf16, #tpu.memory_space<vmem>>, %arg5: memref<1x128xf32, #tpu.memory_space<vmem>>, %arg6: memref<8x128xf32, #tpu.memory_space<vmem>>) attributes {dimension_semantics = [#tpu.dimension_semantics<parallel>, #tpu.dimension_semantics<parallel>, #tpu.dimension_semantics<arbitrary>], iteration_bounds = array<i64: 1, 1, 1>, scalar_prefetch = 0 : i64, scratch_operands = 0 : i64, tpu.core_type = #tpu.core_type<tc>, window_params = [{transform_indices = @transform_0, window_bounds = array<i64: 8, 128>}, {transform_indices = @transform_1, window_bounds = array<i64: 128, 128>}, {transform_indices = @transform_2, window_bounds = array<i64: 1, 128>}, {transform_indices = @transform_3, window_bounds = array<i64: 8, 128>}]} {
    %c0 = arith.constant 0 : index
    %c0_0 = arith.constant 0 : index
    %0 = vector.load %arg3[%c0, %c0_0] : memref<8x128xbf16, #tpu.memory_space<vmem>>, vector<8x128xbf16>
    %c0_1 = arith.constant 0 : index
    %c0_2 = arith.constant 0 : index
    %1 = vector.load %arg4[%c0_1, %c0_2] : memref<128x128xbf16, #tpu.memory_space<vmem>>, vector<128x128xbf16>
    %cst = arith.constant dense<0.000000e+00> : vector<8x128xf32>
    %2 = tpu.matmul %0, %1, %cst {dimension_numbers = #tpu.dot_dimension_numbers<[1], [0], [0], [1], [0, 0, 1, 1], [], []>} : vector<8x128xbf16>, vector<128x128xbf16>, vector<8x128xf32> -> vector<8x128xf32>
    %c0_i32 = arith.constant 0 : i32
    %3 = arith.cmpi eq, %arg2, %c0_i32 : i32
    %4 = arith.extui %3 : i1 to i32
    %c0_i32_3 = arith.constant 0 : i32
    %5 = arith.cmpi ne, %4, %c0_i32_3 : i32
    scf.if %5 {
      %c0_6 = arith.constant 0 : index
      %c0_7 = arith.constant 0 : index
      %9 = vector.load %arg5[%c0_6, %c0_7] : memref<1x128xf32, #tpu.memory_space<vmem>>, vector<1x128xf32>
      %10 = vector.broadcast %9 : vector<1x128xf32> to vector<8x128xf32>
      %11 = arith.addf %10, %2 : vector<8x128xf32>
      %c0_8 = arith.constant 0 : index
      %c0_9 = arith.constant 0 : index
      %12 = vector.load %arg6[%c0_8, %c0_9] : memref<8x128xf32, #tpu.memory_space<vmem>>, vector<8x128xf32>
      tpu.vector_store %arg6[%c0_8, %c0_9], %11 {strides = array<i32>} : memref<8x128xf32, #tpu.memory_space<vmem>>, vector<8x128xf32>,
    } else {
    }
    %c0_i32_4 = arith.constant 0 : i32
    %6 = arith.cmpi sgt, %arg2, %c0_i32_4 : i32
    %7 = arith.extui %6 : i1 to i32
    %c0_i32_5 = arith.constant 0 : i32
    %8 = arith.cmpi ne, %7, %c0_i32_5 : i32
    scf.if %8 {
      %c0_6 = arith.constant 0 : index
      %c0_7 = arith.constant 0 : index
      %9 = vector.load %arg6[%c0_6, %c0_7] : memref<8x128xf32, #tpu.memory_space<vmem>>, vector<8x128xf32>
      %10 = arith.addf %9, %2 : vector<8x128xf32>
      %c0_8 = arith.constant 0 : index
      %c0_9 = arith.constant 0 : index
      %11 = vector.load %arg6[%c0_8, %c0_9] : memref<8x128xf32, #tpu.memory_space<vmem>>, vector<8x128xf32>
      tpu.vector_store %arg6[%c0_8, %c0_9], %10 {strides = array<i32>} : memref<8x128xf32, #tpu.memory_space<vmem>>, vector<8x128xf32>,
    } else {
    }
    return
  }
  func.func @transform_0(%arg0: i32, %arg1: i32, %arg2: i32) -> (i32, i32) {
    %c0_i32 = arith.constant 0 : i32
    return %arg0, %arg2 : i32, i32
  }
  func.func @transform_1(%arg0: i32, %arg1: i32, %arg2: i32) -> (i32, i32) {
    %c0_i32 = arith.constant 0 : i32
    return %arg2, %arg1 : i32, i32
  }
  func.func @transform_2(%arg0: i32, %arg1: i32, %arg2: i32) -> (i32, i32) {
    %c0_i32 = arith.constant 0 : i32
    %c0_i32_0 = arith.constant 0 : i32
    return %c0_i32, %arg1 : i32, i32
  }
  func.func @transform_3(%arg0: i32, %arg1: i32, %arg2: i32) -> (i32, i32) {
    %c0_i32 = arith.constant 0 : i32
    return %arg0, %arg1 : i32, i32
  }
}

</mosaic_0001>

<bundles_post_ra>
// kernel: tpu_custom_call.1
= control target key start
LH: loop header
LB: loop body
LE: loop exit
PB: predicated region body
PF: predicated region fallthrough
CT: control target
= control target key end

     0   :  { %8 = vsyncpa [#allocation3], 0  ;;  %s341_s0 = inlined_call_operand.hbm [shape: bf16[8,128], index: 0, kind: input, shape index: {}]   ;;  %s342_s1 = inlined_call_operand.hbm [shape: bf16[128,128], index: 1, kind: input, shape index: {}]   ;;  %s343_s2 = inlined_call_operand.vmem [shape: f32[1,128], index: 2, kind: input, shape index: {}]   ;;  %s344_s3 = inlined_call_operand.hbm [shape: f32[8,128], index: 3, kind: output, shape index: {}]  }
   0x1   :  { %9 = vsyncpa [#allocation6], 0 }
   0x2   :  { %10 = vsyncpa [#allocation4], 0  ;;  %s302_s12 = smov [#allocation2]   ;;  %s303_s14 = smov [#allocation5]  }
   0x3   :  { %s17_s13 = sshll.u32 %s302_s12, 4  ;;  %s26_s15 = sshll.u32 %s303_s14, 4  ;;  %s18_s13 = int_to_ptr.vmem [resolvable:$true] %s17_s13  ;;  %s27_s15 = int_to_ptr.vmem [resolvable:$true] %s26_s15 }
   0x4   :  { %s244_s16 = scalar_lea.vmem %s18_s13, 64  ;;  %p249_p1 = scmp.lt.s32.totalorder %s18_s13, %s18_s13 }
   0x5   :  { %p245_p0 = scmp.ne.s32.totalorder %s18_s13, %s244_s16  ;;  %p250_p2 = scmp.lt.s32.totalorder %s244_s16, %s244_s16 }
   0x7   :  { %p251_p3 = por %p250_p2, %p249_p1 }
   0x9   :  { %p252_p4 = pnand %p251_p3, %p245_p0 }
   0xb   :  { %255 = shalt.err (!%p252_p4)
}
   0xc   :  { %20 = dma.hbm_to_vmem [thread:$0]  %s341_s0, 64, %s18_s13, [#allocation3]  }
   0xd   :  { %s264_s19 = scalar_lea.vmem %s27_s15, 1024  ;;  %p269_p6 = scmp.lt.s32.totalorder %s27_s15, %s27_s15 }
   0xe   :  { %p265_p5 = scmp.ne.s32.totalorder %s27_s15, %s264_s19  ;;  %p270_p7 = scmp.lt.s32.totalorder %s264_s19, %s264_s19 }
  0x10   :  { %p271_p8 = por %p270_p7, %p269_p6 }
  0x12   :  { %p272_p9 = pnand %p271_p8, %p265_p5 }
  0x14   :  { %275 = shalt.err (!%p272_p9)
}
  0x15   :  { %s304_s20 = smov 64   ;;  %s305_s21 = smov 4  }
  0x16   :  { %32 = dma.hbm_to_vmem [thread:$0]  %s342_s1, 1024, %s27_s15, [#allocation6], %s304_s20, %s304_s20, %s305_s21  }
  0x17   :  { %296 = dma.done.wait [#allocation3], 64  }
  0x18   :  { %297 = vsyncadd [#allocation3], 4294967232 }
  0x19   :  { %298 = dma.done.wait [#allocation6], 1024  }
  0x1a   :  { %299 = vsyncadd [#allocation6], 4294966272  ;;  %v306_v0 = vmov 0.0   ;;  %vm307_vm0 = vmmov 0   ;;  %v228_v1 = vld [vmem:[#allocation5 + $0x38] sm:$0xff]   ;;  %v229_v2 = vld [vmem:[#allocation5 + $0x30] sm:$0xff]  }
  0x1b   :  { %201 = vmatprep.subr.bf16.mxu0 %v306_v0  ;;  %217 = vmatprep.mubr.msk.bf16.mxu0 %vm307_vm0, %v306_v0  ;;  %v230_v3 = vld [vmem:[#allocation5 + $0x28] sm:$0xff]   ;;  %v231_v4 = vld [vmem:[#allocation5 + $0x20] sm:$0xff]   ;;  %v232_v5 = vld [vmem:[#allocation5 + $0x18] sm:$0xff]   ;;  %s308_s24 = smov [#allocation7]  }
  0x1c   :  { %202 = vmatpush3.bf16.msra.mxu0 %v228_v1  ;;  %v233_v6 = vld [vmem:[#allocation5 + $0x10] sm:$0xff]   ;;  %v234_v7 = vld [vmem:[#allocation5 + $0x8] sm:$0xff]   ;;  %v235_v8 = vld [vmem:[#allocation5] sm:$0xff]   ;;  %s173_s25 = sshll.u32 %s308_s24, 4  ;;  %s174_s25 = int_to_ptr.vmem [resolvable:$true] %s173_s25 }
  0x1d   :  { %203 = vmatprep.subr.bf16.mxu0 %v306_v0  ;;  %v42_v9 = vld [vmem:[#allocation2] sm:$0xf]  ;;  %s276_s26 = scalar_lea.vmem %s174_s25, 128  ;;  %p281_p11 = scmp.lt.s32.totalorder %s174_s25, %s174_s25 }
  0x1e   :  { %v191_v10 = vld [vmem:[%s343_s2] ss:$0 sm:$0xff]  ;;  %p277_p10 = scmp.ne.s32.totalorder %s174_s25, %s276_s26  ;;  %p282_p12 = scmp.lt.s32.totalorder %s276_s26, %s276_s26 }
  0x20   :  { %204 = vmatpush3.bf16.msra.mxu0 %v229_v2  ;;  %p283_p13 = por %p282_p12, %p281_p11 }
  0x21   :  { %205 = vmatprep.subr.bf16.mxu0 %v306_v0 }
  0x22   :  { %p284_p0 = pnand %p283_p13, %p277_p10 }
  0x24   :  { %206 = vmatpush3.bf16.msra.mxu0 %v230_v3 }
  0x25   :  { %207 = vmatprep.subr.bf16.mxu0 %v306_v0 }
  0x28   :  { %208 = vmatpush3.bf16.msra.mxu0 %v231_v4 }
  0x29   :  { %209 = vmatprep.subr.bf16.mxu0 %v306_v0 }
  0x2c   :  { %210 = vmatpush3.bf16.msra.mxu0 %v232_v5 }
  0x2d   :  { %211 = vmatprep.subr.bf16.mxu0 %v306_v0 }
  0x30   :  { %212 = vmatpush3.bf16.msra.mxu0 %v233_v6 }
  0x31   :  { %213 = vmatprep.subr.bf16.mxu0 %v306_v0 }
  0x34   :  { %214 = vmatpush3.bf16.msra.mxu0 %v234_v7 }
  0x35   :  { %215 = vmatprep.subr.bf16.mxu0 %v306_v0 }
  0x38   :  { %216 = vmatpush3.bf16.msra.mxu0 %v235_v8 }
  0x3b   :  { %218 = vmatmul.mubr.bf16.vlgmr.msra.gmra.mxu0 %v42_v9 }
  0xfb   :  { %v141_v11 = vpop.f32.mrf.mxu0 }
  0xfc   :  { %v158_v12 = vadd.f32 %v191_v10, %v141_v11 }
  0xfd   :  { %v219_v13 = vpop.f32.mrf.mxu0 }
  0xfe   :  { %159 = vst [vmem:[#allocation7] sm:$0xff] %v158_v12 }
  0xff   :  { %v144_v14 = vpop.f32.mrf.mxu0 }
 0x100   :  { %287 = shalt.err (!%p284_p0)
}
 0x101   :  { %176 = dma.vmem_to_hbm [thread:$0]  %s174_s25, 128, %s344_s3, [#allocation4]   ;;  %v220_v15 = vpop.f32.mrf.mxu0 }
 0x102   :  { %300 = dma.done.wait [#allocation4], 128  }
 0x103   :  { %301 = vsyncadd [#allocation4], 4294967168 }
 0x104   :  { %180 = vsyncpa [#allocation3], 1 }
 0x105   :  { %181 = vsyncpa [#allocation6], 1 }
 0x106   :  { %182 = vsyncpa [#allocation4], 1 }

</bundles_post_ra>
